<compile_context>
chip_gen: v7x
topology: tpu7x:2x2x1
jax: 0.10.0
libtpu: 0.0.40
codegen_flags: <defaults>
</compile_context>

<pallas_src>
import functools
import math

import jax
import jax.numpy as jnp
import numpy as np
from jax import lax
from jax.experimental import pallas as pl
from jax.experimental.pallas import tpu as pltpu


def attention_block_kernel(
    x_ref, w_fused_ref, wo_ref, vecs_ref, o_ref, *,
    num_heads, batch_tile, n_tokens, f_out, gate, ln_eps, identity_skip,
):
    rows = batch_tile * n_tokens
    x = x_ref[...].reshape(rows, -1)                        # [R, Fin]

    # ---- fused Q/K/V(+skip) projection: a single lane-dense matmul ----
    fused = jnp.dot(x, w_fused_ref[...], preferred_element_type=jnp.float32)

    bq   = vecs_ref[0:1, :]
    bk   = vecs_ref[1:2, :]
    bv   = vecs_ref[2:3, :]
    bp   = vecs_ref[3:4, :]
    bo   = vecs_ref[4:5, :]
    ln_g = vecs_ref[5:6, :]
    ln_b = vecs_ref[6:7, :]

    # inner activation 'relu' on Q/K/V.  Wq/bq already carry the 1/sqrt(d)
    # score scale (folded in the wrapper; relu(s*z) == s*relu(z) for s > 0).
    q = jnp.maximum(fused[:, 0 * f_out:1 * f_out] + bq, 0.0)
    k = jnp.maximum(fused[:, 1 * f_out:2 * f_out] + bk, 0.0)
    v = jnp.maximum(fused[:, 2 * f_out:3 * f_out] + bv, 0.0)
    if identity_skip:
        skip = x                                            # proj = nn.Identity()
    else:
        skip = fused[:, 3 * f_out:4 * f_out] + bp

    d = f_out // num_heads
    q3 = q.reshape(batch_tile, n_tokens, f_out)
    k3 = k.reshape(batch_tile, n_tokens, f_out)
    v3 = v.reshape(batch_tile, n_tokens, f_out)

    # ---- per-head attention, batched over the batch-tile axis ----
    head_outs = []
    for h in range(num_heads):                # static, small trip count
        c0 = h * d
        qh = q3[:, :, c0:c0 + d]
        kh = k3[:, :, c0:c0 + d]
        vh = v3[:, :, c0:c0 + d]
        s = jnp.einsum('bnd,bmd->bnm', qh, kh,
                       preferred_element_type=jnp.float32)   # [bt, N, N]
        a = jax.nn.sigmoid(s)                 # score_function='sigmoid' (no softmax)
        head_outs.append(jnp.einsum('bnm,bmd->bnd', a, vh,
                                    preferred_element_type=jnp.float32))
    y3 = head_outs[0] if num_heads == 1 else jnp.concatenate(head_outs, axis=-1)
    y = y3.reshape(rows, f_out)                              # [R, Fout]

    # ---- output projection + 'relu' ----
    y = jnp.maximum(
        jnp.dot(y, wo_ref[...], preferred_element_type=jnp.float32) + bo, 0.0)

    # ---- LayerNorm over features (biased variance, eps inside rsqrt; matches torch) ----
    mu = jnp.mean(y, axis=-1, keepdims=True)
    var = jnp.mean(jnp.square(y - mu), axis=-1, keepdims=True)
    y = (y - mu) * lax.rsqrt(var + ln_eps) * ln_g + ln_b

    # block skip: out = att_out * gate + proj(X)
    out = y * gate + skip
    o_ref[...] = out.reshape(batch_tile, n_tokens, f_out).astype(o_ref.dtype)


def _pick_batch_tile(B, N, target_rows=256):
    """Largest divisor of B keeping batch_tile*N <= ~256 rows per program."""
    best = 1
    for cand in range(1, B + 1):
        if B % cand == 0 and cand * N <= max(target_rows, N):
            best = cand
    return best


def attention_block(x, params, *, num_heads, gate=1.0, ln_eps=1e-5, batch_tile=None):
    B, N, Fin = x.shape
    Fout = params["wq"].shape[1]
    identity_skip = "wp" not in params

    if batch_tile is None:
        batch_tile = _pick_batch_tile(B, N)
    assert B % batch_tile == 0

    # Fold the 1/sqrt(d) score scale into the Q projection (relu is
    # positive-homogeneous, so relu(x@(s*Wq)+s*bq) == s*relu(x@Wq+bq)).
    d = Fout // num_heads
    scale = 1.0 / math.sqrt(d)
    wq = params["wq"] * scale
    bq = params["bq"] * scale

    # Fuse Q/K/V (+ skip-proj) weights into one lane-dense RHS [Fin, 3|4 * Fout].
    wlist = [wq, params["wk"], params["wv"]]
    if not identity_skip:
        wlist.append(params["wp"])
    w_fused = jnp.concatenate(wlist, axis=1)
    w_cols = w_fused.shape[1]

    # Stack all [1, Fout] vectors into a single (8, Fout) array (one DMA, not 7).
    bp = params.get("bp", jnp.zeros((1, Fout), x.dtype))
    vecs = jnp.concatenate(
        [bq, params["bk"], params["bv"], bp,
         params["bo"], params["ln_g"], params["ln_b"],
         jnp.zeros((1, Fout), x.dtype)], axis=0)            # [8, Fout]

    kern = functools.partial(
        attention_block_kernel,
        num_heads=num_heads, batch_tile=batch_tile, n_tokens=N, f_out=Fout,
        gate=float(gate), ln_eps=float(ln_eps), identity_skip=identity_skip)

    # Explicit VMEM budget: resident weights + double-buffered x/out tiles + working set.
    fbytes = 4
    w_bytes = (w_fused.size + params["wo"].size + vecs.size) * fbytes
    io_bytes = batch_tile * N * (Fin + Fout) * fbytes
    work_bytes = (batch_tile * N * (w_cols + 4 * Fout) + batch_tile * N * N * num_heads) * fbytes
    vmem_limit = int(min(64 << 20, max(32 << 20, 2 * (w_bytes + io_bytes) + 4 * work_bytes)))

    grid = (B // batch_tile,)
    return pl.pallas_call(
        kern,
        out_shape=jax.ShapeDtypeStruct((B, N, Fout), x.dtype),
        grid=grid,
        in_specs=[
            pl.BlockSpec((batch_tile, N, Fin), lambda b: (b, 0, 0)),   # X tile
            pl.BlockSpec((Fin, w_cols), lambda b: (0, 0)),             # fused QKV(+P) weight
            pl.BlockSpec((Fout, Fout), lambda b: (0, 0)),              # output-proj weight
            pl.BlockSpec((8, Fout), lambda b: (0, 0)),                 # stacked biases / LN params
        ],
        out_specs=pl.BlockSpec((batch_tile, N, Fout), lambda b: (b, 0, 0)),
        compiler_params=pltpu.CompilerParams(
            dimension_semantics=("parallel",),
            vmem_limit_bytes=vmem_limit),
    )(x, w_fused, params["wo"], vecs)


def make_params(key, in_feat, out_feat):
    """Deterministic torch-Linear-style init (uniform +/- 1/sqrt(fan_in))."""
    ks = jax.random.split(key, 10)

    def linear(kw, kb, fan_in, fan_out):
        bound = 1.0 / math.sqrt(fan_in)
        w = jax.random.uniform(kw, (fan_in, fan_out), jnp.float32, -bound, bound)
        b = jax.random.uniform(kb, (1, fan_out), jnp.float32, -bound, bound)
        return w, b

    wq, bq = linear(ks[0], ks[1], in_feat, out_feat)
    wk, bk = linear(ks[2], ks[3], in_feat, out_feat)
    wv, bv = linear(ks[4], ks[5], in_feat, out_feat)
    wo, bo = linear(ks[6], ks[7], out_feat, out_feat)
    p = dict(
        wq=wq, bq=bq, wk=wk, bk=bk, wv=wv, bv=bv, wo=wo, bo=bo,
        ln_g=jnp.ones((1, out_feat), jnp.float32),
        ln_b=jnp.zeros((1, out_feat), jnp.float32),
    )
    if in_feat != out_feat:  # nn.Linear skip projection; otherwise nn.Identity()
        wp, bp = linear(ks[8], ks[9], in_feat, out_feat)
        p["wp"] = wp
        p["bp"] = bp
    return p


def attention_block_ref(x, p, *, num_heads, gate=1.0, ln_eps=1e-5):
    """Pure-JAX reference with identical math (for correctness check)."""
    q = jnp.maximum(x @ p["wq"] + p["bq"], 0.0)
    k = jnp.maximum(x @ p["wk"] + p["bk"], 0.0)
    v = jnp.maximum(x @ p["wv"] + p["bv"], 0.0)
    B, N, F = q.shape
    d = F // num_heads
    qh = q.reshape(B, N, num_heads, d)
    kh = k.reshape(B, N, num_heads, d)
    vh = v.reshape(B, N, num_heads, d)
    s = jnp.einsum("bnhd,bmhd->bhnm", qh, kh) / math.sqrt(d)
    a = jax.nn.sigmoid(s)
    y = jnp.einsum("bhnm,bmhd->bnhd", a, vh).reshape(B, N, F)
    y = jnp.maximum(y @ p["wo"] + p["bo"], 0.0)
    mu = jnp.mean(y, axis=-1, keepdims=True)
    var = jnp.mean((y - mu) ** 2, axis=-1, keepdims=True)
    y = (y - mu) * jax.lax.rsqrt(var + ln_eps) * p["ln_g"] + p["ln_b"]
    skip = (x @ p["wp"] + p["bp"]) if "wp" in p else x
    return y * gate + skip


if __name__ == "__main__":
    B, N = 2, 8           # batch, tokens
    in_feat, out_feat = 16, 32
    num_heads = 2

    key = jax.random.PRNGKey(0)
    kx, kp = jax.random.split(key)
    x = jax.random.normal(kx, (B, N, in_feat), jnp.float32)
    params = make_params(kp, in_feat, out_feat)

    out = attention_block(x, params, num_heads=num_heads, gate=1.0)
    out = jax.block_until_ready(out)

    ref = attention_block_ref(x, params, num_heads=num_heads, gate=1.0)
    np.testing.assert_allclose(np.asarray(out), np.asarray(ref), rtol=1e-4, atol=1e-4)

    print("KERNEL_OK")
</pallas_src>

<mosaic_0001>
module attributes {stable_mosaic.version = 11 : i64} {
  func.func @attention_block_kernel(%arg0: i32, %arg1: memref<2x8x16xf32, #tpu.memory_space<vmem>>, %arg2: memref<16x128xf32, #tpu.memory_space<vmem>>, %arg3: memref<32x32xf32, #tpu.memory_space<vmem>>, %arg4: memref<8x32xf32, #tpu.memory_space<vmem>>, %arg5: memref<2x8x32xf32, #tpu.memory_space<vmem>>) attributes {dimension_semantics = [#tpu.dimension_semantics<parallel>], iteration_bounds = array<i64: 1>, scalar_prefetch = 0 : i64, scratch_operands = 0 : i64, tpu.core_type = #tpu.core_type<tc>, window_params = [{transform_indices = @transform_0, window_bounds = array<i64: 2, 8, 16>}, {pipeline_mode = #tpu.pipeline_mode<synchronous>, transform_indices = @transform_1, window_bounds = array<i64: 16, 128>}, {pipeline_mode = #tpu.pipeline_mode<synchronous>, transform_indices = @transform_2, window_bounds = array<i64: 32, 32>}, {pipeline_mode = #tpu.pipeline_mode<synchronous>, transform_indices = @transform_3, window_bounds = array<i64: 8, 32>}, {transform_indices = @transform_4, window_bounds = array<i64: 2, 8, 32>}]} {
    %c0 = arith.constant 0 : index
    %c0_0 = arith.constant 0 : index
    %c0_1 = arith.constant 0 : index
    %0 = vector.load %arg1[%c0, %c0_0, %c0_1] : memref<2x8x16xf32, #tpu.memory_space<vmem>>, vector<2x8x16xf32>
    %1 = vector.shape_cast %0 : vector<2x8x16xf32> to vector<16x16xf32>
    %c0_2 = arith.constant 0 : index
    %c0_3 = arith.constant 0 : index
    %2 = vector.load %arg2[%c0_2, %c0_3] : memref<16x128xf32, #tpu.memory_space<vmem>>, vector<16x128xf32>
    %cst = arith.constant dense<0.000000e+00> : vector<16x128xf32>
    %3 = tpu.matmul %1, %2, %cst {dimension_numbers = #tpu.dot_dimension_numbers<[1], [0], [0], [1], [0, 0, 1, 1], [], []>} : vector<16x16xf32>, vector<16x128xf32>, vector<16x128xf32> -> vector<16x128xf32>
    %c0_4 = arith.constant 0 : index
    %c0_5 = arith.constant 0 : index
    %4 = vector.load %arg4[%c0_4, %c0_5] : memref<8x32xf32, #tpu.memory_space<vmem>>, vector<1x32xf32>
    %c1 = arith.constant 1 : index
    %c0_6 = arith.constant 0 : index
    %5 = vector.load %arg4[%c1, %c0_6] : memref<8x32xf32, #tpu.memory_space<vmem>>, vector<1x32xf32>
    %c2 = arith.constant 2 : index
    %c0_7 = arith.constant 0 : index
    %6 = vector.load %arg4[%c2, %c0_7] : memref<8x32xf32, #tpu.memory_space<vmem>>, vector<1x32xf32>
    %c3 = arith.constant 3 : index
    %c0_8 = arith.constant 0 : index
    %7 = vector.load %arg4[%c3, %c0_8] : memref<8x32xf32, #tpu.memory_space<vmem>>, vector<1x32xf32>
    %c4 = arith.constant 4 : index
    %c0_9 = arith.constant 0 : index
    %8 = vector.load %arg4[%c4, %c0_9] : memref<8x32xf32, #tpu.memory_space<vmem>>, vector<1x32xf32>
    %c5 = arith.constant 5 : index
    %c0_10 = arith.constant 0 : index
    %9 = vector.load %arg4[%c5, %c0_10] : memref<8x32xf32, #tpu.memory_space<vmem>>, vector<1x32xf32>
    %c6 = arith.constant 6 : index
    %c0_11 = arith.constant 0 : index
    %10 = vector.load %arg4[%c6, %c0_11] : memref<8x32xf32, #tpu.memory_space<vmem>>, vector<1x32xf32>
    %11 = vector.extract_strided_slice %3 {offsets = [0, 0], sizes = [16, 32], strides = [1, 1]} : vector<16x128xf32> to vector<16x32xf32>
    %12 = vector.broadcast %4 : vector<1x32xf32> to vector<16x32xf32>
    %13 = arith.addf %11, %12 : vector<16x32xf32>
    %cst_12 = arith.constant 0.000000e+00 : f32
    %14 = vector.broadcast %cst_12 : f32 to vector<16x32xf32>
    %15 = arith.maximumf %13, %14 : vector<16x32xf32>
    %16 = vector.extract_strided_slice %3 {offsets = [0, 32], sizes = [16, 32], strides = [1, 1]} : vector<16x128xf32> to vector<16x32xf32>
    %17 = vector.broadcast %5 : vector<1x32xf32> to vector<16x32xf32>
    %18 = arith.addf %16, %17 : vector<16x32xf32>
    %cst_13 = arith.constant 0.000000e+00 : f32
    %19 = vector.broadcast %cst_13 : f32 to vector<16x32xf32>
    %20 = arith.maximumf %18, %19 : vector<16x32xf32>
    %21 = vector.extract_strided_slice %3 {offsets = [0, 64], sizes = [16, 32], strides = [1, 1]} : vector<16x128xf32> to vector<16x32xf32>
    %22 = vector.broadcast %6 : vector<1x32xf32> to vector<16x32xf32>
    %23 = arith.addf %21, %22 : vector<16x32xf32>
    %cst_14 = arith.constant 0.000000e+00 : f32
    %24 = vector.broadcast %cst_14 : f32 to vector<16x32xf32>
    %25 = arith.maximumf %23, %24 : vector<16x32xf32>
    %26 = vector.extract_strided_slice %3 {offsets = [0, 96], sizes = [16, 32], strides = [1, 1]} : vector<16x128xf32> to vector<16x32xf32>
    %27 = vector.broadcast %7 : vector<1x32xf32> to vector<16x32xf32>
    %28 = arith.addf %26, %27 : vector<16x32xf32>
    %29 = vector.shape_cast %15 : vector<16x32xf32> to vector<2x8x32xf32>
    %30 = vector.shape_cast %20 : vector<16x32xf32> to vector<2x8x32xf32>
    %31 = vector.shape_cast %25 : vector<16x32xf32> to vector<2x8x32xf32>
    %32 = vector.extract_strided_slice %29 {offsets = [0, 0, 0], sizes = [2, 8, 16], strides = [1, 1, 1]} : vector<2x8x32xf32> to vector<2x8x16xf32>
    %33 = vector.extract_strided_slice %30 {offsets = [0, 0, 0], sizes = [2, 8, 16], strides = [1, 1, 1]} : vector<2x8x32xf32> to vector<2x8x16xf32>
    %34 = vector.extract_strided_slice %31 {offsets = [0, 0, 0], sizes = [2, 8, 16], strides = [1, 1, 1]} : vector<2x8x32xf32> to vector<2x8x16xf32>
    "tpu.trace_start"() <{level = 10 : i32, message = "bnd,bmd->bnm"}> : () -> ()
    %cst_15 = arith.constant dense<0.000000e+00> : vector<2x8x8xf32>
    %35 = tpu.matmul %32, %33, %cst_15 {dimension_numbers = #tpu.dot_dimension_numbers<[2], [2], [1], [1], [0, 0, 0, 1, 1, 1], [0], [0]>} : vector<2x8x16xf32>, vector<2x8x16xf32>, vector<2x8x8xf32> -> vector<2x8x8xf32>
    "tpu.trace_stop"() : () -> ()
    %36 = arith.negf %35 : vector<2x8x8xf32>
    %37 = math.exp %36 : vector<2x8x8xf32>
    %cst_16 = arith.constant 1.000000e+00 : f32
    %38 = vector.broadcast %cst_16 : f32 to vector<2x8x8xf32>
    %39 = arith.addf %38, %37 : vector<2x8x8xf32>
    %40 = arith.divf %38, %39 : vector<2x8x8xf32>
    "tpu.trace_start"() <{level = 10 : i32, message = "bnm,bmd->bnd"}> : () -> ()
    %cst_17 = arith.constant dense<0.000000e+00> : vector<2x8x16xf32>
    %41 = tpu.matmul %40, %34, %cst_17 {dimension_numbers = #tpu.dot_dimension_numbers<[2], [1], [1], [2], [0, 0, 0, 1, 1, 2], [0], [0]>} : vector<2x8x8xf32>, vector<2x8x16xf32>, vector<2x8x16xf32> -> vector<2x8x16xf32>
    "tpu.trace_stop"() : () -> ()
    %42 = vector.extract_strided_slice %29 {offsets = [0, 0, 16], sizes = [2, 8, 16], strides = [1, 1, 1]} : vector<2x8x32xf32> to vector<2x8x16xf32>
    %43 = vector.extract_strided_slice %30 {offsets = [0, 0, 16], sizes = [2, 8, 16], strides = [1, 1, 1]} : vector<2x8x32xf32> to vector<2x8x16xf32>
    %44 = vector.extract_strided_slice %31 {offsets = [0, 0, 16], sizes = [2, 8, 16], strides = [1, 1, 1]} : vector<2x8x32xf32> to vector<2x8x16xf32>
    "tpu.trace_start"() <{level = 10 : i32, message = "bnd,bmd->bnm"}> : () -> ()
    %cst_18 = arith.constant dense<0.000000e+00> : vector<2x8x8xf32>
    %45 = tpu.matmul %42, %43, %cst_18 {dimension_numbers = #tpu.dot_dimension_numbers<[2], [2], [1], [1], [0, 0, 0, 1, 1, 1], [0], [0]>} : vector<2x8x16xf32>, vector<2x8x16xf32>, vector<2x8x8xf32> -> vector<2x8x8xf32>
    "tpu.trace_stop"() : () -> ()
    %46 = arith.negf %45 : vector<2x8x8xf32>
    %47 = math.exp %46 : vector<2x8x8xf32>
    %cst_19 = arith.constant 1.000000e+00 : f32
    %48 = vector.broadcast %cst_19 : f32 to vector<2x8x8xf32>
    %49 = arith.addf %48, %47 : vector<2x8x8xf32>
    %50 = arith.divf %48, %49 : vector<2x8x8xf32>
    "tpu.trace_start"() <{level = 10 : i32, message = "bnm,bmd->bnd"}> : () -> ()
    %cst_20 = arith.constant dense<0.000000e+00> : vector<2x8x16xf32>
    %51 = tpu.matmul %50, %44, %cst_20 {dimension_numbers = #tpu.dot_dimension_numbers<[2], [1], [1], [2], [0, 0, 0, 1, 1, 2], [0], [0]>} : vector<2x8x8xf32>, vector<2x8x16xf32>, vector<2x8x16xf32> -> vector<2x8x16xf32>
    "tpu.trace_stop"() : () -> ()
    %52 = tpu.concatenate %41, %51 in 2 : vector<2x8x16xf32>, vector<2x8x16xf32> -> vector<2x8x32xf32>
    %53 = vector.shape_cast %52 : vector<2x8x32xf32> to vector<16x32xf32>
    %c0_21 = arith.constant 0 : index
    %c0_22 = arith.constant 0 : index
    %54 = vector.load %arg3[%c0_21, %c0_22] : memref<32x32xf32, #tpu.memory_space<vmem>>, vector<32x32xf32>
    %cst_23 = arith.constant dense<0.000000e+00> : vector<16x32xf32>
    %55 = tpu.matmul %53, %54, %cst_23 {dimension_numbers = #tpu.dot_dimension_numbers<[1], [0], [0], [1], [0, 0, 1, 1], [], []>} : vector<16x32xf32>, vector<32x32xf32>, vector<16x32xf32> -> vector<16x32xf32>
    %56 = vector.broadcast %8 : vector<1x32xf32> to vector<16x32xf32>
    %57 = arith.addf %55, %56 : vector<16x32xf32>
    %cst_24 = arith.constant 0.000000e+00 : f32
    %58 = vector.broadcast %cst_24 : f32 to vector<16x32xf32>
    %59 = arith.maximumf %57, %58 : vector<16x32xf32>
    %cst_25 = arith.constant dense<0.000000e+00> : vector<16xf32>
    %60 = vector.multi_reduction <add>, %59, %cst_25 [1] : vector<16x32xf32> to vector<16xf32>
    %61 = vector.shape_cast %60 : vector<16xf32> to vector<16x1xf32>
    %cst_26 = arith.constant 3.200000e+01 : f32
    %62 = vector.broadcast %cst_26 : f32 to vector<16x1xf32>
    %63 = arith.divf %61, %62 : vector<16x1xf32>
    %64 = vector.broadcast %63 : vector<16x1xf32> to vector<16x32xf32>
    %65 = arith.subf %59, %64 : vector<16x32xf32>
    %66 = arith.mulf %65, %65 : vector<16x32xf32>
    %cst_27 = arith.constant dense<0.000000e+00> : vector<16xf32>
    %67 = vector.multi_reduction <add>, %66, %cst_27 [1] : vector<16x32xf32> to vector<16xf32>
    %68 = vector.shape_cast %67 : vector<16xf32> to vector<16x1xf32>
    %cst_28 = arith.constant 3.200000e+01 : f32
    %69 = vector.broadcast %cst_28 : f32 to vector<16x1xf32>
    %70 = arith.divf %68, %69 : vector<16x1xf32>
    %71 = vector.broadcast %63 : vector<16x1xf32> to vector<16x32xf32>
    %72 = arith.subf %59, %71 : vector<16x32xf32>
    %cst_29 = arith.constant 9.99999974E-6 : f32
    %73 = vector.broadcast %cst_29 : f32 to vector<16x1xf32>
    %74 = arith.addf %70, %73 : vector<16x1xf32>
    %75 = math.rsqrt %74 : vector<16x1xf32>
    %76 = vector.broadcast %75 : vector<16x1xf32> to vector<16x32xf32>
    %77 = arith.mulf %72, %76 : vector<16x32xf32>
    %78 = vector.broadcast %9 : vector<1x32xf32> to vector<16x32xf32>
    %79 = arith.mulf %77, %78 : vector<16x32xf32>
    %80 = vector.broadcast %10 : vector<1x32xf32> to vector<16x32xf32>
    %81 = arith.addf %79, %80 : vector<16x32xf32>
    %cst_30 = arith.constant 1.000000e+00 : f32
    %82 = vector.broadcast %cst_30 : f32 to vector<16x32xf32>
    %83 = arith.mulf %81, %82 : vector<16x32xf32>
    %84 = arith.addf %83, %28 : vector<16x32xf32>
    %85 = vector.shape_cast %84 : vector<16x32xf32> to vector<2x8x32xf32>
    %c0_31 = arith.constant 0 : index
    %c0_32 = arith.constant 0 : index
    %c0_33 = arith.constant 0 : index
    %86 = vector.load %arg5[%c0_31, %c0_32, %c0_33] : memref<2x8x32xf32, #tpu.memory_space<vmem>>, vector<2x8x32xf32>
    tpu.vector_store %arg5[%c0_31, %c0_32, %c0_33], %85 {strides = array<i32>} : memref<2x8x32xf32, #tpu.memory_space<vmem>>, vector<2x8x32xf32>,
    return
  }
  func.func @transform_0(%arg0: i32) -> (i32, i32, i32) {
    %c0_i32 = arith.constant 0 : i32
    %c0_i32_0 = arith.constant 0 : i32
    %c0_i32_1 = arith.constant 0 : i32
    return %arg0, %c0_i32, %c0_i32_0 : i32, i32, i32
  }
  func.func @transform_1(%arg0: i32) -> (i32, i32) {
    %c0_i32 = arith.constant 0 : i32
    %c0_i32_0 = arith.constant 0 : i32
    %c0_i32_1 = arith.constant 0 : i32
    return %c0_i32, %c0_i32_0 : i32, i32
  }
  func.func @transform_2(%arg0: i32) -> (i32, i32) {
    %c0_i32 = arith.constant 0 : i32
    %c0_i32_0 = arith.constant 0 : i32
    %c0_i32_1 = arith.constant 0 : i32
    return %c0_i32, %c0_i32_0 : i32, i32
  }
  func.func @transform_3(%arg0: i32) -> (i32, i32) {
    %c0_i32 = arith.constant 0 : i32
    %c0_i32_0 = arith.constant 0 : i32
    %c0_i32_1 = arith.constant 0 : i32
    return %c0_i32, %c0_i32_0 : i32, i32
  }
  func.func @transform_4(%arg0: i32) -> (i32, i32, i32) {
    %c0_i32 = arith.constant 0 : i32
    %c0_i32_0 = arith.constant 0 : i32
    %c0_i32_1 = arith.constant 0 : i32
    return %arg0, %c0_i32, %c0_i32_0 : i32, i32, i32
  }
}

</mosaic_0001>

<bundles_post_ra>
// kernel: tpu_custom_call.1
= control target key start
LH: loop header
LB: loop body
LE: loop exit
PB: predicated region body
PF: predicated region fallthrough
CT: control target
= control target key end

     0   :  { %9 = vsyncpa [#allocation3], 0  ;;  %s1454_s0 = inlined_call_operand.hbm [shape: f32[2,8,16], index: 0, kind: input, shape index: {}]   ;;  %s1455_s1 = inlined_call_operand.hbm [shape: f32[16,128], index: 1, kind: input, shape index: {}]   ;;  %s1456_s2 = inlined_call_operand.hbm [shape: f32[32,32], index: 2, kind: input, shape index: {}]   ;;  %s1457_s3 = inlined_call_operand.vmem [shape: f32[8,32], index: 3, kind: input, shape index: {}]   ;;  %s1458_s4 = inlined_call_operand.hbm [shape: f32[2,8,32], index: 4, kind: output, shape index: {}]  }
   0x1   :  { %10 = vsyncpa [#allocation6], 0 }
   0x2   :  { %11 = vsyncpa [#allocation4], 0  ;;  %s1260_s15 = smov [#allocation5]   ;;  %s1261_s17 = smov [#allocation2]  }
   0x3   :  { %s29_s16 = sshll.u32 %s1260_s15, 4  ;;  %s17_s18 = sshll.u32 %s1261_s17, 4  ;;  %s30_s16 = int_to_ptr.vmem [resolvable:$true] %s29_s16  ;;  %s1300_s18 = int_to_ptr.vmem [resolvable:$true] %s17_s18 }
   0x4   :  { %s1166_s21 = scalar_lea.hbm %s1455_s1, 256 }
   0x5   :  { %p1167_p0 = scmp.ne.s32.totalorder %s1455_s1, %s1166_s21  ;;  %p1170_p1 = scmp.lt.u32.totalorder %s1166_s21, %s1455_s1 }
   0x7   :  { %p1172_p2 = pnand %p1170_p1, %p1167_p0 }
   0x9   :  { %1175 = shalt.err (!%p1172_p2)
}
   0xa   :  { %s1176_s26 = scalar_lea.vmem %s30_s16, 256  ;;  %p1181_p4 = scmp.lt.s32.totalorder %s30_s16, %s30_s16 }
   0xb   :  { %p1177_p3 = scmp.ne.s32.totalorder %s30_s16, %s1176_s26  ;;  %p1182_p5 = scmp.lt.s32.totalorder %s1176_s26, %s1176_s26 }
   0xd   :  { %p1183_p6 = por %p1182_p5, %p1181_p4 }
   0xf   :  { %p1184_p7 = pnand %p1183_p6, %p1177_p3 }
  0x11   :  { %1187 = shalt.err (!%p1184_p7)
}
  0x12   :  { %s1262_s27 = smov 128   ;;  %s1263_s28 = smov 8  }
  0x13   :  { %35 = dma.hbm_to_vmem [thread:$0]  %s1455_s1, 256, %s30_s16, [#allocation6], %s1262_s27, %s1262_s27, %s1263_s28  }
  0x14   :  { %s1188_s7 = scalar_lea.hbm %s1454_s0, 256 }
  0x15   :  { %p1189_p8 = scmp.ne.s32.totalorder %s1454_s0, %s1188_s7  ;;  %p1192_p9 = scmp.lt.u32.totalorder %s1188_s7, %s1454_s0 }
  0x17   :  { %p1194_p10 = pnand %p1192_p9, %p1189_p8 }
  0x19   :  { %1197 = shalt.err (!%p1194_p10)
}
  0x1a   :  { %s1198_s12 = scalar_lea.vmem %s1300_s18, 256  ;;  %p1203_p12 = scmp.lt.s32.totalorder %s1300_s18, %s1300_s18 }
  0x1b   :  { %p1199_p11 = scmp.ne.s32.totalorder %s1300_s18, %s1198_s12  ;;  %p1204_p13 = scmp.lt.s32.totalorder %s1198_s12, %s1198_s12 }
  0x1d   :  { %p1205_p0 = por %p1204_p13, %p1203_p12 }
  0x1f   :  { %p1206_p1 = pnand %p1205_p0, %p1199_p11 }
  0x21   :  { %1209 = shalt.err (!%p1206_p1)
}
  0x22   :  { %23 = dma.hbm_to_vmem [thread:$0]  %s1454_s0, 256, %s1300_s18, [#allocation3], %s1262_s27, %s1262_s27, %s1263_s28  }
  0x23   :  { %s1264_s14 = smov [#allocation7]   ;;  %s1210_s19 = scalar_lea.hbm %s1456_s2, 512 }
  0x24   :  { %s41_s15 = sshll.u32 %s1264_s14, 4  ;;  %p1211_p2 = scmp.ne.s32.totalorder %s1456_s2, %s1210_s19  ;;  %s42_s15 = int_to_ptr.vmem [resolvable:$true] %s41_s15 }
  0x25   :  { %p1214_p3 = scmp.lt.u32.totalorder %s1210_s19, %s1456_s2 }
  0x27   :  { %p1216_p4 = pnand %p1214_p3, %p1211_p2 }
  0x29   :  { %1219 = shalt.err (!%p1216_p4)
}
  0x2a   :  { %s1220_s24 = scalar_lea.vmem %s42_s15, 512  ;;  %p1225_p6 = scmp.lt.s32.totalorder %s42_s15, %s42_s15 }
  0x2b   :  { %p1221_p5 = scmp.ne.s32.totalorder %s42_s15, %s1220_s24  ;;  %p1226_p7 = scmp.lt.s32.totalorder %s1220_s24, %s1220_s24 }
  0x2d   :  { %p1227_p8 = por %p1226_p7, %p1225_p6 }
  0x2f   :  { %p1228_p9 = pnand %p1227_p8, %p1221_p5 }
  0x31   :  { %1231 = shalt.err (!%p1228_p9)
}
  0x32   :  { %47 = dma.hbm_to_vmem [thread:$0]  %s1456_s2, 512, %s42_s15, [#allocation6], %s1262_s27, %s1262_s27, %s1263_s28  }
  0x33   :  { %1254 = dma.done.wait [#allocation3], 256  }
  0x34   :  { %1255 = vsyncadd [#allocation3], 4294967040 }
  0x35   :  { %1256 = dma.done.wait [#allocation6], 768  }
  0x36   :  { %1257 = vsyncadd [#allocation6], 4294966528  ;;  %vm63_vm0 = vcmask 130048   ;;  %v61_v0 = vld [vmem:[#allocation5] sm:$0xff]  ;;  %v62_v1 = vld [vmem:[#allocation5 + $0x8] sm:$0xff]  ;;  %s1265_s29 = smov 32  }
  0x37   :  { %v59_v2 = vld [vmem:[#allocation2] sm:$0xff]  ;;  %v1119_v3 = vpack.c.bf16 %v62_v1, %v61_v0  ;;  %v60_v5 = vld [vmem:[#allocation2 + $0x8] sm:$0xff]  ;;  %v1266_v6 = vmov 0.0   ;;  %vm1267_vm1 = vmmov 0   ;;  %s1268_s2 = smov 96   ;;  %s1269_s6 = smov 64  }
  0x38   :  { %1065 = vmatprep.mubr.msk.f32.mxu0 %vm63_vm0, %v59_v2  ;;  %v1011_v4 = vld [vmem:[%s1457_s3 + $0x1] ss:$0 sm:$0xff]  ;;  %1068 = vmatprep.subr.mxu1 %v1266_v6  ;;  %v1012_v14 = vld [vmem:[%s1457_s3 + $0x2] ss:$0 sm:$0xff]  ;;  %v1010_v15 = vld [vmem:[%s1457_s3] ss:$0 sm:$0xff] }
  0x39   :  { %165 = vrot.lane.b32.xlu0 %v1011_v4, %s1265_s29  ;;  %1120 = vmatprep.subr.bf16.mxu0 %v1119_v3  ;;  %s1270_s9 = smov 80   ;;  %s1271_s10 = smov 112   ;;  %vm366_vm2 = vcmask 64512   ;;  %v847_v63 = vld [vmem:[#allocation7] sm:$0xff]  ;;  %v848_v0 = vld [vmem:[#allocation7 + $0x8] sm:$0xff]  ;;  %v849_v2 = vld [vmem:[#allocation7 + $0x10] sm:$0xff] }
  0x3a   :  { %1122 = vmatpush3.bf16.msra.mxu0 %v1119_v3  ;;  %1070 = vmatprep.mubr.msk.f32.mxu1 %vm1267_vm1, %v1266_v6  ;;  %s1272_s11 = smov 48   ;;  %v1123_v1 = vpack.c.bf16 %v848_v0, %v847_v63  ;;  %v850_v3 = vld [vmem:[#allocation7 + $0x18] sm:$0xff]  ;;  %s1273_s12 = smov 16   ;;  %vm855_vm3 = vcmask 261120  }
  0x3b   :  { %1073 = vmatprep.subr.mxu0 %v1266_v6  ;;  %v1127_v4 = vpack.c.bf16 %v850_v3, %v849_v2  ;;  %s1274_s21 = smov [#allocation8]  }
  0x3c   :  { %s995_s22 = sshll.u32 %s1274_s21, 4  ;;  %s996_s22 = int_to_ptr.vmem [resolvable:$true] %s995_s22 }
  0x3d   :  { %1066 = vmatmul.mubr.msk.f32.vlgmr.msra.gmra.mrb[0].mxu0 %vm63_vm0, %v60_v5  ;;  %s1232_s23 = scalar_lea.vmem %s996_s22, 256  ;;  %p1237_p11 = scmp.lt.s32.totalorder %s996_s22, %s996_s22 }
  0x3e   :  { %1075 = vmatprep.mubr.msk.f32.mxu0 %vm1267_vm1, %v1266_v6  ;;  %p1233_p10 = scmp.ne.s32.totalorder %s996_s22, %s1232_s23  ;;  %p1238_p12 = scmp.lt.s32.totalorder %s1232_s23, %s1232_s23 }
  0x40   :  { %p1239_p13 = por %p1238_p12, %p1237_p11 }
  0x42   :  { %p1240_p0 = pnand %p1239_p13, %p1233_p10 }
  0xab   :  { %v166_v7 = vpop.permute.xlu0 %165 }
 0x110   :  { %v1364_v8 = vpop.f32.mrb[0].mxu0 }
 0x111   :  { %v1366_v9 = vpop.f32.mrb[1].mxu0  ;;  %v169_v10 = vadd.f32 %v1364_v8, %v166_v7  ;;  %v157_v16 = vadd.f32 %v1364_v8, %v1010_v15 }
 0x112   :  { %v168_v11 = vadd.f32 %v166_v7, %v1366_v9  ;;  %v156_v17 = vadd.f32 %v1010_v15, %v1366_v9  ;;  %v1030_v15 = vld [vmem:[%s1457_s3 + $0x4] ss:$0 sm:$0xff] }
 0x113   :  { %v171_v12 = vmax.f32 %v169_v10, 0.0  ;;  %v159_v20 = vmax.f32 %v157_v16, 0.0 }
 0x114   :  { %v170_v13 = vmax.f32 %v168_v11, 0.0  ;;  %v158_v21 = vmax.f32 %v156_v17, 0.0 }
 0x115   :  { %273 = vrot.lane.b32.xlu1 %v171_v12, %s1268_s2 }
 0x116   :  { %195 = vrot.lane.b32.xlu0 %v170_v13, %s1268_s2 }
 0x119   :  { %177 = vrot.lane.b32.xlu1 %v1012_v14, %s1269_s6 }
 0x187   :  { %v274_v18 = vpop.permute.xlu1 %273 }
 0x188   :  { %1074 = vmatpush3.xpose.msk.msra.mxu0 %vm63_vm0, %v274_v18  ;;  %v196_v19 = vpop.permute.xlu0 %195 }
 0x189   :  { %1069 = vmatpush3.xpose.msk.msra.mxu1 %vm63_vm0, %v196_v19  ;;  %1083 = vmatprep.subr.mxu0 %v1266_v6 }
 0x18a   :  { %1078 = vmatprep.subr.mxu1 %v1266_v6 }
 0x18b   :  { %v178_v22 = vpop.permute.xlu1 %177  ;;  %1076 = vmatmul.mubr.msk.f32.vlgmr.msra.gmra.mrb[2].mxu0 %vm63_vm0, %v159_v20 }
 0x18c   :  { %v180_v23 = vadd.f32 %v178_v22, %v1366_v9  ;;  %v181_v24 = vadd.f32 %v1364_v8, %v178_v22  ;;  %1071 = vmatmul.mubr.msk.f32.vlgmr.msra.gmra.mrb[0].mxu1 %vm63_vm0, %v158_v21  ;;  %1085 = vmatprep.mubr.msk.f32.mxu0 %vm1267_vm1, %v1266_v6 }
 0x18d   :  { %1080 = vmatprep.mubr.msk.f32.mxu1 %vm1267_vm1, %v1266_v6 }
 0x18e   :  { %v182_v25 = vmax.f32 %v180_v23, 0.0  ;;  %v183_v26 = vmax.f32 %v181_v24, 0.0  ;;  %v1013_v24 = vld [vmem:[%s1457_s3 + $0x3] ss:$0 sm:$0xff] }
 0x190   :  { %441 = vrot.lane.b32.xlu1 %v183_v26, %s1269_s6  ;;  %363 = vrot.lane.b32.xlu0 %v182_v25, %s1269_s6 }
 0x194   :  { %597 = vrot.lane.b32.xlu1 %v171_v12, %s1270_s9  ;;  %519 = vrot.lane.b32.xlu0 %v170_v13, %s1270_s9 }
 0x198   :  { %595 = vrot.lane.b32.xlu1 %v159_v20, %s1271_s10  ;;  %517 = vrot.lane.b32.xlu0 %v158_v21, %s1271_s10 }
 0x19c   :  { %761 = vrot.lane.b32.xlu1 %v183_v26, %s1272_s11  ;;  %685 = vrot.lane.b32.xlu0 %v182_v25, %s1272_s11 }
 0x202   :  { %v442_v27 = vpop.permute.xlu1 %441  ;;  %v364_v28 = vpop.permute.xlu0 %363 }
 0x203   :  { %1079 = vmatpush3.msra.mxu1 %v364_v28  ;;  %1084 = vmatpush3.msra.mxu0 %v442_v27 }
 0x204   :  { %1093 = vmatprep.subr.mxu0 %v1266_v6  ;;  %1088 = vmatprep.subr.mxu1 %v1266_v6 }
 0x206   :  { %v598_v39 = vpop.permute.xlu1 %597  ;;  %v520_v40 = vpop.permute.xlu0 %519 }
 0x20a   :  { %v596_v41 = vpop.permute.xlu1 %595  ;;  %v518_v43 = vpop.permute.xlu0 %517 }
 0x20e   :  { %v762_v45 = vpop.permute.xlu1 %761  ;;  %v686_v46 = vpop.permute.xlu0 %685 }
 0x25e   :  { %v346_v29 = vpop.f32.mrb[2].mxu0 }
 0x25f   :  { %v1019_v30 = vmul.f32 -1.442695, %v346_v29  ;;  %v268_v31 = vpop.f32.mrb[0].mxu1  ;;  %v1077_v32 = vpop.f32.mrb[3].mxu0 }
 0x260   :  { %v1018_v33 = vmul.f32 -1.442695, %v268_v31  ;;  %v1072_v34 = vpop.f32.mrb[1].mxu1 }
 0x261   :  { %1146 = vpow2.f32 %v1019_v30 }
 0x262   :  { %1148 = vpow2.f32 %v1018_v33 }
 0x26b   :  { %v1147_v35 = vpop.eup %1146 }
 0x26c   :  { %v1149_v36 = vpop.eup %1148  ;;  %v357_v37 = vadd.f32 1.0, %v1147_v35 }
 0x26d   :  { %v356_v38 = vadd.f32 1.0, %v1149_v36 }
 0x26e   :  { %1150 = vrcp.f32 %v357_v37 }
 0x26f   :  { %1152 = vrcp.f32 %v356_v38 }
 0x278   :  { %v1151_v42 = vpop.eup %1150 }
 0x279   :  { %v1153_v44 = vpop.eup %1152  ;;  %1086 = vmatmul.mubr.msk.f32.vlgmr.msra.gmra.mrb[4].mxu0 %vm366_vm2, %v1151_v42 }
 0x27a   :  { %1094 = vmatpush3.xpose.msk.msra.mxu0 %vm63_vm0, %v598_v39  ;;  %1081 = vmatmul.mubr.msk.f32.vlgmr.msra.gmra.mrb[2].mxu1 %vm366_vm2, %v1153_v44  ;;  %v1033_v44 = vld [vmem:[%s1457_s3 + $0x5] ss:$0 sm:$0xff] }
 0x27b   :  { %1089 = vmatpush3.xpose.msk.msra.mxu1 %vm63_vm0, %v520_v40  ;;  %1095 = vmatprep.mubr.msk.f32.mxu0 %vm1267_vm1, %v1266_v6 }
 0x27c   :  { %1103 = vmatprep.subr.mxu0 %v1266_v6  ;;  %1090 = vmatprep.mubr.msk.f32.mxu1 %vm1267_vm1, %v1266_v6 }
 0x27d   :  { %1096 = vmatmul.mubr.msk.f32.vlgmr.msra.gmra.mrb[6].mxu0 %vm63_vm0, %v596_v41  ;;  %1098 = vmatprep.subr.mxu1 %v1266_v6 }
 0x27e   :  { %1104 = vmatpush3.msra.mxu0 %v762_v45  ;;  %1091 = vmatmul.mubr.msk.f32.vlgmr.msra.gmra.mrb[4].mxu1 %vm63_vm0, %v518_v43 }
 0x27f   :  { %1099 = vmatpush3.msra.mxu1 %v686_v46  ;;  %1105 = vmatprep.mubr.msk.f32.mxu0 %vm1267_vm1, %v1266_v6 }
 0x280   :  { %1100 = vmatprep.mubr.msk.f32.mxu1 %vm1267_vm1, %v1266_v6  ;;  %1124 = vmatprep.subr.bf16.mxu1 %v1123_v1 }
 0x34c   :  { %v513_v47 = vpop.f32.mrb[4].mxu0 }
 0x34d   :  { %v436_v48 = vpop.f32.mrb[2].mxu1  ;;  %v1087_v49 = vpop.f32.mrb[5].mxu0 }
 0x34e   :  { %v1082_v50 = vpop.f32.mrb[3].mxu1 }
 0x350   :  { %v669_v51 = vpop.f32.mrb[6].mxu0 }
 0x351   :  { %v1027_v52 = vmul.f32 -1.442695, %v669_v51  ;;  %v591_v53 = vpop.f32.mrb[4].mxu1  ;;  %v1097_v54 = vpop.f32.mrb[7].mxu0 }
 0x352   :  { %v1026_v55 = vmul.f32 -1.442695, %v591_v53  ;;  %v1092_v56 = vpop.f32.mrb[5].mxu1 }
 0x353   :  { %1154 = vpow2.f32 %v1027_v52 }
 0x354   :  { %1156 = vpow2.f32 %v1026_v55 }
 0x35d   :  { %v1155_v57 = vpop.eup %1154 }
 0x35e   :  { %v1157_v58 = vpop.eup %1156  ;;  %v680_v59 = vadd.f32 1.0, %v1155_v57 }
 0x35f   :  { %v679_v60 = vadd.f32 1.0, %v1157_v58 }
 0x360   :  { %1158 = vrcp.f32 %v680_v59 }
 0x361   :  { %1160 = vrcp.f32 %v679_v60 }
 0x36a   :  { %v1159_v61 = vpop.eup %1158 }
 0x36b   :  { %v1161_v62 = vpop.eup %1160  ;;  %1106 = vmatmul.mubr.msk.f32.vlgmr.msra.gmra.mrb[8].mxu0 %vm366_vm2, %v1159_v61 }
 0x36c   :  { %1101 = vmatmul.mubr.msk.f32.vlgmr.msra.gmra.mrb[6].mxu1 %vm366_vm2, %v1161_v62 }
 0x36d   :  { %1126 = vmatpush3.bf16.msra.mxu1 %v1123_v1 }
 0x36e   :  { %1128 = vmatprep.subr.bf16.mxu1 %v1127_v4 }
 0x371   :  { %1130 = vmatpush3.bf16.msra.mxu1 %v1127_v4 }
 0x43e   :  { %v833_v5 = vpop.f32.mrb[8].mxu0 }
 0x43f   :  { %841 = vrot.lane.b32.xlu1 %v833_v5, %s1273_s12  ;;  %v757_v6 = vpop.f32.mrb[6].mxu1  ;;  %v1107_v7 = vpop.f32.mrb[9].mxu0 }
 0x440   :  { %839 = vrot.lane.b32.xlu0 %v757_v6, %s1273_s12  ;;  %v1102_v10 = vpop.f32.mrb[7].mxu1 }
 0x4b1   :  { %v842_v11 = vpop.permute.xlu1 %841 }
 0x4b2   :  { %v840_v12 = vpop.permute.xlu0 %839  ;;  %v846_v14 = vsel %vm63_vm0, %v513_v47, %v842_v11 }
 0x4b3   :  { %v845_v13 = vsel %vm63_vm0, %v436_v48, %v840_v12 }
 0x4b4   :  { %1116 = vmatprep.mubr.msk.f32.mxu1 %vm855_vm3, %v845_v13 }
 0x4b5   :  { %1117 = vmatmul.mubr.msk.f32.vlgmr.msra.gmra.mrb[8].mxu1 %vm855_vm3, %v846_v14 }
 0x588   :  { %v1118_v16 = vpop.f32.mrb[8].mxu1 }
 0x589   :  { %v934_v17 = vadd.f32 %v1118_v16, %v1030_v15  ;;  %v928_v18 = vpop.f32.mrb[9].mxu1 }
 0x58a   :  { %v929_v19 = vadd.f32 %v1030_v15, %v928_v18 }
 0x58b   :  { %v938_v20 = vmax.f32 %v934_v17, 0.0 }
 0x58c   :  { %v937_v21 = vmax.f32 %v929_v19, 0.0 }
 0x58d   :  { %v942_v22 = vsel %vm855_vm3, %v938_v20, 0.0 }
 0x58e   :  { %943 = vadd.xlane.f32.xlu1 %v942_v22  ;;  %v939_v23 = vsel %vm855_vm3, %v937_v21, 0.0 }
 0x58f   :  { %940 = vadd.xlane.f32.xlu0 %v939_v23 }
 0x5a5   :  { %189 = vrot.lane.b32.xlu0 %v1013_v24, %s1268_s2 }
 0x61b   :  { %v944_v25 = vpop.xlane.xlu1 %943 }
 0x61c   :  { %v947_v26 = vmul.f32 0.03125, %v944_v25  ;;  %v941_v27 = vpop.xlane.xlu0 %940 }
 0x61d   :  { %v946_v28 = vmul.f32 0.03125, %v941_v27 }
 0x61e   :  { %v949_v29 = vsub.f32 %v938_v20, %v947_v26 }
 0x61f   :  { %v948_v30 = vsub.f32 %v937_v21, %v946_v28 }
 0x620   :  { %v190_v31 = vpop.permute.xlu0 %189  ;;  %v951_v32 = vmul.f32 %v949_v29, %v949_v29 }
 0x621   :  { %v193_v33 = vadd.f32 %v1364_v8, %v190_v31  ;;  %v950_v35 = vmul.f32 %v948_v30, %v948_v30  ;;  %v192_v37 = vadd.f32 %v190_v31, %v1366_v9  ;;  %v1034_v9 = vld [vmem:[%s1457_s3 + $0x6] ss:$0 sm:$0xff] }
 0x622   :  { %v955_v34 = vsel %vm855_vm3, %v951_v32, 0.0 }
 0x623   :  { %956 = vadd.xlane.f32.xlu1 %v955_v34  ;;  %982 = vrot.lane.b32.xlu0 %v193_v33, %s1265_s29  ;;  %v952_v36 = vsel %vm855_vm3, %v950_v35, 0.0 }
 0x627   :  { %953 = vadd.xlane.f32.xlu1 %v952_v36 }
 0x638   :  { %980 = vrot.lane.b32.xlu1 %v192_v37, %s1265_s29 }
 0x695   :  { %v983_v50 = vpop.permute.xlu0 %982 }
 0x6b0   :  { %v957_v38 = vpop.xlane.xlu1 %956 }
 0x6b1   :  { %v959_v39 = vmul.f32 0.03125, %v957_v38 }
 0x6b3   :  { %v961_v40 = vadd.f32 1e-05, %v959_v39 }
 0x6b4   :  { %v954_v41 = vpop.xlane.xlu1 %953 }
 0x6b5   :  { %1162 = vrsqrt.f32 %v961_v40  ;;  %v958_v42 = vmul.f32 0.03125, %v954_v41 }
 0x6b7   :  { %v960_v8 = vadd.f32 1e-05, %v958_v42 }
 0x6b8   :  { %v981_v54 = vpop.permute.xlu1 %980 }
 0x6b9   :  { %1164 = vrsqrt.f32 %v960_v8 }
 0x6bf   :  { %v1163_v43 = vpop.eup %1162 }
 0x6c0   :  { %v965_v45 = vmul.f32 %v1163_v43, %v949_v29 }
 0x6c2   :  { %v971_v46 = vmul.f32 %v1033_v44, %v965_v45 }
 0x6c3   :  { %v1165_v47 = vpop.eup %1164 }
 0x6c4   :  { %v964_v48 = vmul.f32 %v1165_v47, %v948_v30  ;;  %v977_v49 = vadd.f32 %v1034_v9, %v971_v46 }
 0x6c6   :  { %v970_v51 = vmul.f32 %v1033_v44, %v964_v48  ;;  %v987_v52 = vadd.f32 %v983_v50, %v977_v49 }
 0x6c8   :  { %v976_v53 = vadd.f32 %v1034_v9, %v970_v51  ;;  %989 = vst.msk [vmem:[#allocation8 + $0x8] sm:$0xff] %vm855_vm3, %v987_v52 }
 0x6ca   :  { %v986_v55 = vadd.f32 %v981_v54, %v976_v53 }
 0x6cc   :  { %988 = vst.msk [vmem:[#allocation8] sm:$0xff] %vm855_vm3, %v986_v55 }
 0x6cd   :  { %1243 = shalt.err (!%p1240_p0)
}
 0x6ce   :  { %s1244_s0 = scalar_lea.hbm %s1458_s4, 256 }
 0x6cf   :  { %p1245_p1 = scmp.ne.s32.totalorder %s1458_s4, %s1244_s0  ;;  %p1248_p2 = scmp.lt.u32.totalorder %s1244_s0, %s1458_s4 }
 0x6d1   :  { %p1250_p3 = pnand %p1248_p2, %p1245_p1 }
 0x6d3   :  { %1253 = shalt.err (!%p1250_p3)
}
 0x6d4   :  { %1001 = dma.vmem_to_hbm [thread:$0]  %s996_s22, 256, %s1458_s4, [#allocation4], %s1262_s27, %s1262_s27, %s1263_s28  }
 0x6d5   :  { %1258 = dma.done.wait [#allocation4], 256  }
 0x6d6   :  { %1259 = vsyncadd [#allocation4], 4294967040 }
 0x6d7   :  { %1005 = vsyncpa [#allocation3], 1 }
 0x6d8   :  { %1006 = vsyncpa [#allocation6], 1 }
 0x6d9   :  { %1007 = vsyncpa [#allocation4], 1 }

</bundles_post_ra>
